<compile_context>
chip_gen: v6e
topology: v6e:2x2x1
jax: 0.10.0
libtpu: 0.0.40
codegen_flags: <defaults>
</compile_context>

<pallas_src>
import functools
import math

import jax
import jax.numpy as jnp
from jax.experimental import pallas as pl
from jax.experimental.pallas import tpu as pltpu

EPS_GN = 1e-5                 # nn.GroupNorm default eps
EPS_SIG = 1e-5                # inverse_sigmoid eps
MATMUL_DTYPE = jnp.bfloat16   # MXU input dtype (f32 accumulate everywhere)
Y_DTYPE = jnp.bfloat16        # conv1x1 intermediate between pass 1 and pass 2
PACK = 128                    # lane-dense packed width for the heads output


def _round_up(x, m):
    return (x + m - 1) // m * m


# ----------------------------------------------------------------------------
# Kernel 1a: streaming 1x1 conv (bias-free matmul over channels) + per-channel
#            partial sums for GroupNorm, accumulated across HW tiles.
# grid = (B, n_hw_tiles); the HW axis is the last ("arbitrary") axis so the
# stats output blocks (index independent of it) stay resident and accumulate.
# The ragged last tile (HW % tile != 0) is masked in-kernel (OOB rows of the
# partial input block are garbage in VMEM); Pallas masks the partial y writes.
# ----------------------------------------------------------------------------
def _conv1x1_stats_kernel(x_ref, w_ref, y_ref, s_ref, ss_ref, *,
                          n_valid, tile_hw, needs_mask):
    t = pl.program_id(1)
    x = x_ref[...]                                                # (T, Cin) f32
    if needs_mask:   # static: only when HW is not a multiple of the tile
        row = jax.lax.broadcasted_iota(jnp.int32, x.shape, 0) + t * tile_hw
        x = jnp.where(row < n_valid, x, 0.0)      # select, safe for NaN garbage

    y = jnp.dot(x.astype(MATMUL_DTYPE), w_ref[...],
                preferred_element_type=jnp.float32)               # (T, Cout) f32
    y_ref[...] = y.astype(y_ref.dtype)                            # bf16 intermediate

    @pl.when(t == 0)
    def _():
        s_ref[...] = jnp.zeros_like(s_ref)
        ss_ref[...] = jnp.zeros_like(ss_ref)

    # stats from the f32 in-register value (bias-free; masked rows contribute 0)
    s_ref[...] += jnp.sum(y, axis=0, keepdims=True)
    ss_ref[...] += jnp.sum(y * y, axis=0, keepdims=True)


# Kernel 1b: apply GroupNorm as a per-(batch, channel) affine: y*scale + shift.
def _gn_apply_kernel(y_ref, scale_ref, shift_ref, o_ref):
    y = y_ref[...].astype(jnp.float32)
    o_ref[...] = (y * scale_ref[...] + shift_ref[...]).astype(o_ref.dtype)


def conv1x1_groupnorm(x_bsc, w, b, gamma, beta, num_groups=32, hw_tile=1024,
                      out_dtype=jnp.float32):
    """x_bsc: [B, HW, Cin] (channels-last); w: [Cin, Cout]; -> [B, HW, Cout].

    out_dtype can be jnp.bfloat16 when the downstream transformer consumes
    bf16 (halves the write traffic of the largest tensors this module emits).
    """
    B, HW, Cin = x_bsc.shape
    Cout = w.shape[1]
    assert Cout % num_groups == 0
    cg = Cout // num_groups

    tile = min(hw_tile, HW)        # full-dim block when HW <= hw_tile
    if tile != HW:
        assert tile % 8 == 0, "hw_tile must be a multiple of 8"
    n_tiles = pl.cdiv(HW, tile)
    needs_mask = (HW % tile) != 0

    kernel = functools.partial(_conv1x1_stats_kernel, n_valid=HW,
                               tile_hw=tile, needs_mask=needs_mask)
    # Streaming tiles keep per-step VMEM to a few MiB even at real ViDT
    # feature-map sizes, so the default scoped VMEM limit suffices on
    # v5e / v6e / v7x (no vmem_limit_bytes override needed).
    y, s, ss = pl.pallas_call(
        kernel,
        out_shape=(jax.ShapeDtypeStruct((B, HW, Cout), Y_DTYPE),
                   jax.ShapeDtypeStruct((B, 1, Cout), jnp.float32),
                   jax.ShapeDtypeStruct((B, 1, Cout), jnp.float32)),
        grid=(B, n_tiles),
        in_specs=[
            pl.BlockSpec((None, tile, Cin), lambda bi, t: (bi, t, 0)),
            pl.BlockSpec((Cin, Cout), lambda bi, t: (0, 0)),
        ],
        out_specs=(pl.BlockSpec((None, tile, Cout), lambda bi, t: (bi, t, 0)),
                   pl.BlockSpec((None, 1, Cout), lambda bi, t: (bi, 0, 0)),
                   pl.BlockSpec((None, 1, Cout), lambda bi, t: (bi, 0, 0))),
        compiler_params=pltpu.CompilerParams(
            dimension_semantics=("parallel", "arbitrary")),
    )(x_bsc, w.astype(MATMUL_DTYPE))

    # Tiny per-(batch, group) reduction in plain JAX.  The conv bias is applied
    # analytically (shifted form) so the variance never sees a large-mean
    # E[y^2]-E[y]^2 cancellation from the bias, and padded/masked rows
    # contribute exactly zero to the stats.
    n = float(HW * cg)
    s_g = s.reshape(B, num_groups, cg)              # per-channel sums of y
    ss_g = ss.reshape(B, num_groups, cg)            # per-channel sum-sq of y
    b_g = b.reshape(num_groups, cg)
    s_sum = s_g.sum(axis=-1)                        # (B, G)
    ss_sum = ss_g.sum(axis=-1)
    my = s_sum / n                                  # group mean of y
    mb = b_g.mean(axis=-1)                          # group mean of bias
    var_y = ss_sum / n - my * my                    # group var of y (bias-free)
    db = b_g - mb[:, None]
    cross = (2.0 / n) * jnp.sum(db[None, :, :] * (s_g - HW * my[:, :, None]),
                                axis=-1)            # 2*cov(y, b) over the group
    var_b = jnp.mean(db * db, axis=-1)              # group var of bias
    var = jnp.maximum(var_y + cross + var_b[None, :], 0.0)
    rstd = jax.lax.rsqrt(var + EPS_GN)              # (B, G)
    mean = my + mb[None, :]                         # group mean of (y + b)

    rstd_c = jnp.repeat(rstd, cg, axis=-1)          # (B, Cout)
    mean_c = jnp.repeat(mean, cg, axis=-1)
    scale = (gamma[None, :] * rstd_c)[:, None, :]                       # (B,1,Cout)
    shift = (beta[None, :]
             + (b[None, :] - mean_c) * gamma[None, :] * rstd_c)[:, None, :]

    out = pl.pallas_call(
        _gn_apply_kernel,
        out_shape=jax.ShapeDtypeStruct((B, HW, Cout), out_dtype),
        grid=(B, n_tiles),
        in_specs=[
            pl.BlockSpec((None, tile, Cout), lambda bi, t: (bi, t, 0)),
            pl.BlockSpec((None, 1, Cout), lambda bi, t: (bi, 0, 0)),
            pl.BlockSpec((None, 1, Cout), lambda bi, t: (bi, 0, 0)),
        ],
        out_specs=pl.BlockSpec((None, tile, Cout), lambda bi, t: (bi, t, 0)),
        compiler_params=pltpu.CompilerParams(
            dimension_semantics=("parallel", "parallel")),
    )(y, scale, shift)
    return out


# ----------------------------------------------------------------------------
# Kernel 2: per-level detection heads, tiled over B*Q rows.
#   class_embed (Linear D->1) and bbox_embed layer 3 (D->4) are packed into
#   lane-dense (D, 128) projections; the output tile is (tile_bq, 128) with
#   col 0 = class logit and cols 1:5 = box coordinates.
#   Grid = (L, n_bq_tiles); the weight blocks are indexed only by L, so they
#   are not re-fetched across consecutive BQ tiles of the same level.
# ----------------------------------------------------------------------------
def _heads_kernel(hs_ref, refp_ref, w1_ref, b1_ref, w2_ref, b2_ref,
                  wcp_ref, w3p_ref, bo_ref, out_ref, *, offset):
    x = hs_ref[...].astype(MATMUL_DTYPE)                          # (T, D)

    # bbox MLP hidden layers (bf16 MXU, f32 accumulate, f32 relu)
    h = jnp.dot(x, w1_ref[...], preferred_element_type=jnp.float32) + b1_ref[...]
    h = jnp.maximum(h, 0.0).astype(MATMUL_DTYPE)
    h = jnp.dot(h, w2_ref[...], preferred_element_type=jnp.float32) + b2_ref[...]
    h = jnp.maximum(h, 0.0).astype(MATMUL_DTYPE)

    # packed head projection: col 0 <- class(x), cols 1:5 <- bbox layer 3(h)
    packed = (jnp.dot(x, wcp_ref[...], preferred_element_type=jnp.float32)
              + jnp.dot(h, w3p_ref[...], preferred_element_type=jnp.float32)
              + bo_ref[...])                                      # (T, 128)

    # inverse_sigmoid_offset(reference), already lane-aligned with packed layout
    r = refp_ref[...]                                             # (T, 128)
    if offset:
        r = (r + 0.5) * 0.5
    r = jnp.clip(r, 0.0, 1.0)
    r_inv = jnp.log(jnp.maximum(r, EPS_SIG) / jnp.maximum(1.0 - r, EPS_SIG))
    tmp = packed + r_inv

    # sigmoid_offset: exp on the EUP + approx reciprocal (EUP slot, no VALU divide)
    sig = pl.reciprocal(1.0 + jnp.exp(-tmp), approx=True)
    if offset:
        sig = sig * 2.0 - 0.5

    col = jax.lax.broadcasted_iota(jnp.int32, sig.shape, 1)
    out_ref[...] = jnp.where(col == 0, packed, sig)   # col0: raw logit; 1:5: boxes


def detection_heads(hs, refs, wc, bc, w1, b1, w2, b2, w3, b3, *,
                    offset=True, bq_tile=512):
    """hs: (L,B,Q,D); refs: (L,B,Q,4); wc: (L,1,D); bc: (L,1,1);
       w1/w2: (L,D,D); b1/b2: (L,1,D); w3: (L,D,4); b3: (L,1,4)."""
    L, B, Q, D = hs.shape
    BQ = B * Q
    BQp = _round_up(BQ, 8)          # explicit sublane-aligned row count
    hs_r = hs.reshape(L, BQ, D)
    # references padded into the packed lane layout (col 0 unused, cols 1:5 = ref)
    refs_p = jnp.pad(refs.reshape(L, BQ, 4), ((0, 0), (0, 0), (1, PACK - 5)))
    if BQp != BQ:
        hs_r = jnp.pad(hs_r, ((0, 0), (0, BQp - BQ), (0, 0)))
        refs_p = jnp.pad(refs_p, ((0, 0), (0, BQp - BQ), (0, 0)))

    tile = min(bq_tile, BQp)
    if tile != BQp:
        assert tile % 8 == 0
    n_bq = pl.cdiv(BQp, tile)

    # packed output projection / bias: col 0 <- class head, cols 1:5 <- bbox l3
    wcp = jnp.pad(jnp.transpose(wc, (0, 2, 1)), ((0, 0), (0, 0), (0, PACK - 1)))
    w3p = jnp.pad(w3, ((0, 0), (0, 0), (1, PACK - 5)))
    bop = jnp.pad(jnp.concatenate([bc, b3], axis=-1), ((0, 0), (0, 0), (0, PACK - 5)))

    mx = lambda a: a.astype(MATMUL_DTYPE)
    kernel = functools.partial(_heads_kernel, offset=offset)
    packed = pl.pallas_call(
        kernel,
        out_shape=jax.ShapeDtypeStruct((L, BQp, PACK), jnp.float32),
        grid=(L, n_bq),
        in_specs=[
            pl.BlockSpec((None, tile, D), lambda l, t: (l, t, 0)),
            pl.BlockSpec((None, tile, PACK), lambda l, t: (l, t, 0)),
            pl.BlockSpec((None, D, D), lambda l, t: (l, 0, 0)),
            pl.BlockSpec((None, 1, D), lambda l, t: (l, 0, 0)),
            pl.BlockSpec((None, D, D), lambda l, t: (l, 0, 0)),
            pl.BlockSpec((None, 1, D), lambda l, t: (l, 0, 0)),
            pl.BlockSpec((None, D, PACK), lambda l, t: (l, 0, 0)),
            pl.BlockSpec((None, D, PACK), lambda l, t: (l, 0, 0)),
            pl.BlockSpec((None, 1, PACK), lambda l, t: (l, 0, 0)),
        ],
        out_specs=pl.BlockSpec((None, tile, PACK), lambda l, t: (l, t, 0)),
        compiler_params=pltpu.CompilerParams(
            dimension_semantics=("parallel", "parallel")),
    )(hs_r, refs_p, mx(w1), b1, mx(w2), b2, mx(wcp), mx(w3p), bop)

    logits = packed[:, :BQ, 0:1].reshape(L, B, Q, 1)
    boxes = packed[:, :BQ, 1:5].reshape(L, B, Q, 4)
    return logits, boxes


# ----------------------------------------------------------------------------
# ViDT forward (glue in plain JAX, hot paths in the kernels above)
# ----------------------------------------------------------------------------
def vidt_forward(params, features, mask, det_tgt, det_pos, hs,
                 init_reference, inter_references, *, aux_loss=True, offset=True):
    # TODO(synk): backbone & transformer are external modules in the original
    # ViDT; their outputs are taken as inputs here instead of being recomputed.
    B = mask.shape[0]
    D = params["hidden_dim"]

    # det token / positional-query projections: [B, C, T] -> [B, T, D]
    det_tgt_p = conv1x1_groupnorm(jnp.transpose(det_tgt, (0, 2, 1)),
                                  *params["tgt_proj"])
    det_pos_p = conv1x1_groupnorm(jnp.transpose(det_pos, (0, 2, 1)),
                                  *params["query_pos_proj"])

    srcs, masks = [], []
    for l, feat in enumerate(features):
        Bf, C, H, W = feat.shape
        x = jnp.transpose(feat, (0, 2, 3, 1)).reshape(Bf, H * W, C)   # NCHW -> [B,HW,C]
        y = conv1x1_groupnorm(x, *params["input_proj"][l])
        # srcs kept channels-last [B, H, W, D]; transpose to NCHW only if a
        # downstream consumer really needs it (saves a full HBM round trip).
        srcs.append(y.reshape(Bf, H, W, D))
        m = jax.image.resize(mask.astype(jnp.float32), (B, H, W),
                             method="nearest") > 0.5
        masks.append(m)

    # prediction heads per decoder level
    L = hs.shape[0]
    refs = jnp.concatenate([init_reference[None], inter_references[:L - 1]], axis=0)
    logits, boxes = detection_heads(
        hs, refs,
        params["class_w"], params["class_b"],
        params["bbox_w1"], params["bbox_b1"],
        params["bbox_w2"], params["bbox_b2"],
        params["bbox_w3"], params["bbox_b3"],
        offset=offset)

    out = {"pred_logits": logits[-1], "pred_boxes": boxes[-1]}
    if aux_loss and L > 1:
        out["aux_outputs"] = [{"pred_logits": logits[i], "pred_boxes": boxes[i]}
                              for i in range(L - 1)]
    aux = dict(det_tgt=det_tgt_p, det_pos=det_pos_p, srcs=srcs, masks=masks,
               logits=logits, boxes=boxes)
    return out, aux


# ----------------------------------------------------------------------------
# Pure-jnp references (same bf16 matmul casts as the kernels) for correctness.
# ----------------------------------------------------------------------------
def conv1x1_gn_ref(x, w, b, gamma, beta, num_groups=32):
    B, HW, Cin = x.shape
    Cout = w.shape[1]
    y = jnp.einsum("bsc,cd->bsd", x.astype(MATMUL_DTYPE), w.astype(MATMUL_DTYPE),
                   preferred_element_type=jnp.float32) + b[None, None, :]
    cg = Cout // num_groups
    yg = y.reshape(B, HW, num_groups, cg)
    mean = yg.mean(axis=(1, 3), keepdims=True)
    var = ((yg - mean) ** 2).mean(axis=(1, 3), keepdims=True)
    yn = ((yg - mean) / jnp.sqrt(var + EPS_GN)).reshape(B, HW, Cout)
    return yn * gamma[None, None, :] + beta[None, None, :]


def heads_ref(hs, refs, wc, bc, w1, b1, w2, b2, w3, b3, offset=True):
    c = lambda a: a.astype(MATMUL_DTYPE)
    logits = jnp.einsum("lbqd,lkd->lbqk", c(hs), c(wc),
                        preferred_element_type=jnp.float32) + bc[:, None]
    h = jax.nn.relu(jnp.einsum("lbqd,lde->lbqe", c(hs), c(w1),
                               preferred_element_type=jnp.float32) + b1[:, None])
    h = jax.nn.relu(jnp.einsum("lbqd,lde->lbqe", c(h), c(w2),
                               preferred_element_type=jnp.float32) + b2[:, None])
    tmp = jnp.einsum("lbqd,lde->lbqe", c(h), c(w3),
                     preferred_element_type=jnp.float32) + b3[:, None]
    r = refs
    if offset:
        r = (r + 0.5) / 2.0
    r = jnp.clip(r, 0.0, 1.0)
    r_inv = jnp.log(jnp.maximum(r, EPS_SIG) / jnp.maximum(1.0 - r, EPS_SIG))
    tmp = tmp + r_inv
    sig = jax.nn.sigmoid(tmp)
    if offset:
        sig = sig * 2.0 - 0.5
    return logits, sig


# ----------------------------------------------------------------------------
# Parameter construction (deterministic, shapes from ViDT.__init__)
# ----------------------------------------------------------------------------
def xavier_uniform(key, shape):
    fan_in, fan_out = shape[0], shape[1]
    limit = math.sqrt(6.0 / (fan_in + fan_out))
    return jax.random.uniform(key, shape, jnp.float32, -limit, limit)


def make_params(key, num_channels, hidden_dim, num_levels):
    keys = iter(jax.random.split(key, 64))
    bias_value = -math.log((1 - 0.01) / 0.01)   # class_embed bias init

    # NOTE: torch zero-inits the conv bias and uses gamma=1 / beta=0; random
    # values are used here so the bias-folded GroupNorm math and the affine
    # path are numerically exercised.
    def proj(cin):
        return (xavier_uniform(next(keys), (cin, hidden_dim)),            # conv w
                0.5 * jax.random.normal(next(keys), (hidden_dim,), jnp.float32),
                1.0 + 0.1 * jax.random.normal(next(keys), (hidden_dim,), jnp.float32),
                0.1 * jax.random.normal(next(keys), (hidden_dim,), jnp.float32))

    params = {
        "hidden_dim": hidden_dim,
        "tgt_proj": proj(num_channels[-2]),
        "query_pos_proj": proj(hidden_dim),
        "input_proj": [proj(c) for c in num_channels],
        # with_box_refine=True -> per-level (cloned) heads.
        # NOTE: torch zero-inits the last bbox layer; random values are used
        # here so the kernel matmuls are numerically exercised.
        "class_w": jax.random.normal(next(keys), (num_levels, 1, hidden_dim),
                                     jnp.float32) * 0.1,
        "class_b": jnp.full((num_levels, 1, 1), bias_value, jnp.float32),
        "bbox_w1": jax.random.normal(next(keys), (num_levels, hidden_dim, hidden_dim),
                                     jnp.float32) * 0.1,
        "bbox_b1": jax.random.normal(next(keys), (num_levels, 1, hidden_dim),
                                     jnp.float32) * 0.1,
        "bbox_w2": jax.random.normal(next(keys), (num_levels, hidden_dim, hidden_dim),
                                     jnp.float32) * 0.1,
        "bbox_b2": jax.random.normal(next(keys), (num_levels, 1, hidden_dim),
                                     jnp.float32) * 0.1,
        "bbox_w3": jax.random.normal(next(keys), (num_levels, hidden_dim, 4),
                                     jnp.float32) * 0.1,
        "bbox_b3": jax.random.normal(next(keys), (num_levels, 1, 4),
                                     jnp.float32) * 0.1,
    }
    return params


# ----------------------------------------------------------------------------
if __name__ == "__main__":
    # batch, hidden (lane-dense >=128 per review), queries, det tokens, layers
    B, D, Q, T, L = 2, 128, 16, 16, 3
    num_channels = [32, 64, 128]                   # backbone channels per level
    level_hw = [(16, 16), (8, 8), (4, 4)]

    key = jax.random.PRNGKey(0)
    k_inp, k_par = jax.random.split(key)
    ks = iter(jax.random.split(k_inp, 32))

    # synthetic backbone / transformer outputs (external modules)
    features = [jax.random.normal(next(ks), (B, c, h, w), jnp.float32)
                for c, (h, w) in zip(num_channels, level_hw)]
    mask = jax.random.uniform(next(ks), (B, 32, 32)) > 0.8       # padded-pixel mask
    det_tgt = jax.random.normal(next(ks), (B, num_channels[-2], T), jnp.float32)
    det_pos = jax.random.normal(next(ks), (B, D, T), jnp.float32)
    hs = jax.random.normal(next(ks), (L, B, Q, D), jnp.float32)
    init_reference = jax.nn.sigmoid(jax.random.normal(next(ks), (B, Q, 4)))
    inter_references = jax.nn.sigmoid(jax.random.normal(next(ks), (L, B, Q, 4)))

    params = make_params(k_par, num_channels, D, L)

    out, aux = vidt_forward(params, features, mask, det_tgt, det_pos, hs,
                            init_reference, inter_references,
                            aux_loss=True, offset=True)
    jax.block_until_ready(out["pred_boxes"])
    jax.block_until_ready(out["pred_logits"])

    # correctness check against plain-jnp references
    TOL = dict(atol=2e-2, rtol=2e-2)    # slightly loose: bf16 y intermediate
    refs = jnp.concatenate([init_reference[None], inter_references[:L - 1]], axis=0)
    ref_logits, ref_boxes = heads_ref(
        hs, refs, params["class_w"], params["class_b"],
        params["bbox_w1"], params["bbox_b1"],
        params["bbox_w2"], params["bbox_b2"],
        params["bbox_w3"], params["bbox_b3"], offset=True)
    assert jnp.allclose(aux["logits"], ref_logits, **TOL)
    assert jnp.allclose(aux["boxes"], ref_boxes, **TOL)

    tgt_ref = conv1x1_gn_ref(jnp.transpose(det_tgt, (0, 2, 1)), *params["tgt_proj"])
    assert jnp.allclose(aux["det_tgt"], tgt_ref, **TOL)
    pos_ref = conv1x1_gn_ref(jnp.transpose(det_pos, (0, 2, 1)),
                             *params["query_pos_proj"])
    assert jnp.allclose(aux["det_pos"], pos_ref, **TOL)

    src_refs = []
    for l, feat in enumerate(features):
        Bf, C, H, W = feat.shape
        x = jnp.transpose(feat, (0, 2, 3, 1)).reshape(Bf, H * W, C)
        src_ref = conv1x1_gn_ref(x, *params["input_proj"][l])
        src_refs.append(src_ref)
        got = aux["srcs"][l].reshape(Bf, H * W, D)
        assert jnp.allclose(got, src_ref, **TOL)

    # extra coverage: ragged HW tiling (partial blocks + in-kernel stats mask)
    Bf, C, H, W = features[0].shape
    x0 = jnp.transpose(features[0], (0, 2, 3, 1)).reshape(Bf, H * W, C)
    got_r = conv1x1_groupnorm(x0, *params["input_proj"][0], hw_tile=96)
    jax.block_until_ready(got_r)
    assert jnp.allclose(got_r, src_refs[0], **TOL)

    # extra coverage: BQ-tiled heads path (multiple BQ tiles per level)
    lg2, bx2 = detection_heads(
        hs, refs, params["class_w"], params["class_b"],
        params["bbox_w1"], params["bbox_b1"],
        params["bbox_w2"], params["bbox_b2"],
        params["bbox_w3"], params["bbox_b3"], offset=True, bq_tile=16)
    jax.block_until_ready(bx2)
    assert jnp.allclose(lg2, ref_logits, **TOL)
    assert jnp.allclose(bx2, ref_boxes, **TOL)

    print("KERNEL_OK")
</pallas_src>

<mosaic_0001>
module attributes {stable_mosaic.version = 11 : i64} {
  func.func @_conv1x1_stats_kernel(%arg0: i32, %arg1: i32, %arg2: memref<1x16x64xf32, #tpu.memory_space<vmem>>, %arg3: memref<64x128xbf16, #tpu.memory_space<vmem>>, %arg4: memref<1x16x128xbf16, #tpu.memory_space<vmem>>, %arg5: memref<1x1x128xf32, #tpu.memory_space<vmem>>, %arg6: memref<1x1x128xf32, #tpu.memory_space<vmem>>) attributes {dimension_semantics = [#tpu.dimension_semantics<parallel>, #tpu.dimension_semantics<arbitrary>], iteration_bounds = array<i64: 2, 1>, scalar_prefetch = 0 : i64, scratch_operands = 0 : i64, tpu.core_type = #tpu.core_type<tc>, window_params = [{transform_indices = @transform_0, window_bounds = array<i64: 1, 16, 64>}, {pipeline_mode = #tpu.pipeline_mode<synchronous>, transform_indices = @transform_1, window_bounds = array<i64: 64, 128>}, {transform_indices = @transform_2, window_bounds = array<i64: 1, 16, 128>}, {transform_indices = @transform_3, window_bounds = array<i64: 1, 1, 128>}, {transform_indices = @transform_4, window_bounds = array<i64: 1, 1, 128>}]} {
    %c0 = arith.constant 0 : index
    %c0_0 = arith.constant 0 : index
    %c0_1 = arith.constant 0 : index
    %0 = vector.load %arg2[%c0, %c0_0, %c0_1] : memref<1x16x64xf32, #tpu.memory_space<vmem>>, vector<1x16x64xf32>
    %1 = vector.shape_cast %0 : vector<1x16x64xf32> to vector<16x64xf32>
    %2 = arith.truncf %1 : vector<16x64xf32> to vector<16x64xbf16>
    %c0_2 = arith.constant 0 : index
    %c0_3 = arith.constant 0 : index
    %3 = vector.load %arg3[%c0_2, %c0_3] : memref<64x128xbf16, #tpu.memory_space<vmem>>, vector<64x128xbf16>
    %cst = arith.constant dense<0.000000e+00> : vector<16x128xf32>
    %4 = tpu.matmul %2, %3, %cst {dimension_numbers = #tpu.dot_dimension_numbers<[1], [0], [0], [1], [0, 0, 1, 1], [], []>} : vector<16x64xbf16>, vector<64x128xbf16>, vector<16x128xf32> -> vector<16x128xf32>
    %5 = arith.truncf %4 : vector<16x128xf32> to vector<16x128xbf16>
    %c0_4 = arith.constant 0 : index
    %c0_5 = arith.constant 0 : index
    %c0_6 = arith.constant 0 : index
    %6 = vector.load %arg4[%c0_4, %c0_5, %c0_6] : memref<1x16x128xbf16, #tpu.memory_space<vmem>>, vector<1x16x128xbf16>
    %7 = vector.shape_cast %6 : vector<1x16x128xbf16> to vector<16x128xbf16>
    %8 = vector.shape_cast %5 : vector<16x128xbf16> to vector<1x16x128xbf16>
    tpu.vector_store %arg4[%c0_4, %c0_5, %c0_6], %8 {strides = array<i32>} : memref<1x16x128xbf16, #tpu.memory_space<vmem>>, vector<1x16x128xbf16>,
    %c0_i32 = arith.constant 0 : i32
    %9 = arith.cmpi eq, %arg1, %c0_i32 : i32
    %10 = arith.extui %9 : i1 to i32
    %c0_i32_7 = arith.constant 0 : i32
    %11 = arith.cmpi ne, %10, %c0_i32_7 : i32
    scf.if %11 {
      %cst_22 = arith.constant 0.000000e+00 : f32
      %29 = vector.broadcast %cst_22 : f32 to vector<1x128xf32>
      %c0_23 = arith.constant 0 : index
      %c0_24 = arith.constant 0 : index
      %c0_25 = arith.constant 0 : index
      %30 = vector.load %arg5[%c0_23, %c0_24, %c0_25] : memref<1x1x128xf32, #tpu.memory_space<vmem>>, vector<1x1x128xf32>
      %31 = vector.shape_cast %30 : vector<1x1x128xf32> to vector<1x128xf32>
      %32 = vector.shape_cast %29 : vector<1x128xf32> to vector<1x1x128xf32>
      tpu.vector_store %arg5[%c0_23, %c0_24, %c0_25], %32 {strides = array<i32>} : memref<1x1x128xf32, #tpu.memory_space<vmem>>, vector<1x1x128xf32>,
      %cst_26 = arith.constant 0.000000e+00 : f32
      %33 = vector.broadcast %cst_26 : f32 to vector<1x128xf32>
      %c0_27 = arith.constant 0 : index
      %c0_28 = arith.constant 0 : index
      %c0_29 = arith.constant 0 : index
      %34 = vector.load %arg6[%c0_27, %c0_28, %c0_29] : memref<1x1x128xf32, #tpu.memory_space<vmem>>, vector<1x1x128xf32>
      %35 = vector.shape_cast %34 : vector<1x1x128xf32> to vector<1x128xf32>
      %36 = vector.shape_cast %33 : vector<1x128xf32> to vector<1x1x128xf32>
      tpu.vector_store %arg6[%c0_27, %c0_28, %c0_29], %36 {strides = array<i32>} : memref<1x1x128xf32, #tpu.memory_space<vmem>>, vector<1x1x128xf32>,
    } else {
    }
    %c0_8 = arith.constant 0 : index
    %c0_9 = arith.constant 0 : index
    %c0_10 = arith.constant 0 : index
    %12 = vector.load %arg5[%c0_8, %c0_9, %c0_10] : memref<1x1x128xf32, #tpu.memory_space<vmem>>, vector<1x1x128xf32>
    %13 = vector.shape_cast %12 : vector<1x1x128xf32> to vector<1x128xf32>
    %cst_11 = arith.constant dense<0.000000e+00> : vector<128xf32>
    %14 = vector.multi_reduction <add>, %4, %cst_11 [0] : vector<16x128xf32> to vector<128xf32>
    %15 = vector.shape_cast %14 : vector<128xf32> to vector<1x128xf32>
    %16 = arith.addf %13, %15 : vector<1x128xf32>
    %c0_12 = arith.constant 0 : index
    %c0_13 = arith.constant 0 : index
    %c0_14 = arith.constant 0 : index
    %17 = vector.load %arg5[%c0_12, %c0_13, %c0_14] : memref<1x1x128xf32, #tpu.memory_space<vmem>>, vector<1x1x128xf32>
    %18 = vector.shape_cast %17 : vector<1x1x128xf32> to vector<1x128xf32>
    %19 = vector.shape_cast %16 : vector<1x128xf32> to vector<1x1x128xf32>
    tpu.vector_store %arg5[%c0_12, %c0_13, %c0_14], %19 {strides = array<i32>} : memref<1x1x128xf32, #tpu.memory_space<vmem>>, vector<1x1x128xf32>,
    %c0_15 = arith.constant 0 : index
    %c0_16 = arith.constant 0 : index
    %c0_17 = arith.constant 0 : index
    %20 = vector.load %arg6[%c0_15, %c0_16, %c0_17] : memref<1x1x128xf32, #tpu.memory_space<vmem>>, vector<1x1x128xf32>
    %21 = vector.shape_cast %20 : vector<1x1x128xf32> to vector<1x128xf32>
    %22 = arith.mulf %4, %4 : vector<16x128xf32>
    %cst_18 = arith.constant dense<0.000000e+00> : vector<128xf32>
    %23 = vector.multi_reduction <add>, %22, %cst_18 [0] : vector<16x128xf32> to vector<128xf32>
    %24 = vector.shape_cast %23 : vector<128xf32> to vector<1x128xf32>
    %25 = arith.addf %21, %24 : vector<1x128xf32>
    %c0_19 = arith.constant 0 : index
    %c0_20 = arith.constant 0 : index
    %c0_21 = arith.constant 0 : index
    %26 = vector.load %arg6[%c0_19, %c0_20, %c0_21] : memref<1x1x128xf32, #tpu.memory_space<vmem>>, vector<1x1x128xf32>
    %27 = vector.shape_cast %26 : vector<1x1x128xf32> to vector<1x128xf32>
    %28 = vector.shape_cast %25 : vector<1x128xf32> to vector<1x1x128xf32>
    tpu.vector_store %arg6[%c0_19, %c0_20, %c0_21], %28 {strides = array<i32>} : memref<1x1x128xf32, #tpu.memory_space<vmem>>, vector<1x1x128xf32>,
    return
  }
  func.func @transform_0(%arg0: i32, %arg1: i32) -> (i32, i32, i32) {
    %c0_i32 = arith.constant 0 : i32
    %c0_i32_0 = arith.constant 0 : i32
    return %arg0, %arg1, %c0_i32 : i32, i32, i32
  }
  func.func @transform_1(%arg0: i32, %arg1: i32) -> (i32, i32) {
    %c0_i32 = arith.constant 0 : i32
    %c0_i32_0 = arith.constant 0 : i32
    %c0_i32_1 = arith.constant 0 : i32
    return %c0_i32, %c0_i32_0 : i32, i32
  }
  func.func @transform_2(%arg0: i32, %arg1: i32) -> (i32, i32, i32) {
    %c0_i32 = arith.constant 0 : i32
    %c0_i32_0 = arith.constant 0 : i32
    return %arg0, %arg1, %c0_i32 : i32, i32, i32
  }
  func.func @transform_3(%arg0: i32, %arg1: i32) -> (i32, i32, i32) {
    %c0_i32 = arith.constant 0 : i32
    %c0_i32_0 = arith.constant 0 : i32
    %c0_i32_1 = arith.constant 0 : i32
    return %arg0, %c0_i32, %c0_i32_0 : i32, i32, i32
  }
  func.func @transform_4(%arg0: i32, %arg1: i32) -> (i32, i32, i32) {
    %c0_i32 = arith.constant 0 : i32
    %c0_i32_0 = arith.constant 0 : i32
    %c0_i32_1 = arith.constant 0 : i32
    return %arg0, %c0_i32, %c0_i32_0 : i32, i32, i32
  }
}

</mosaic_0001>

<bundles_post_ra>
// kernel: tpu_custom_call.1
= control target key start
LH: loop header
LB: loop body
LE: loop exit
PB: predicated region body
PF: predicated region fallthrough
CT: control target
= control target key end

     0   :  { %s1223_s0 = inlined_call_operand.hbm [shape: f32[2,16,64], index: 0, kind: input, shape index: {}]   ;;  %s1224_s1 = inlined_call_operand.hbm [shape: bf16[64,128], index: 1, kind: input, shape index: {}]   ;;  %s1225_s2 = inlined_call_operand.hbm [shape: bf16[2,16,128], index: 2, kind: output, shape index: {0}]   ;;  %s1226_s3 = inlined_call_operand.hbm [shape: f32[2,1,128], index: 3, kind: output, shape index: {1}]   ;;  %s1227_s4 = inlined_call_operand.hbm [shape: f32[2,1,128], index: 4, kind: output, shape index: {2}]  }
   0x1   :  { %1230 = sst [smem:[#allocation15_spill]] %s1224_s1 }
   0x2   :  { %10 = vsyncpa [#allocation3], 0 }
   0x3   :  { %12 = vsyncpa [#allocation3 + $0x1], 0 }
   0x4   :  { %13 = vsyncpa [#allocation6], 0 }
   0x5   :  { %14 = vsyncpa [#allocation4], 0 }
   0x6   :  { %16 = vsyncpa [#allocation4 + $0x1], 0 }
   0x7   :  { %17 = vsyncpa [#allocation9], 0 }
   0x8   :  { %19 = vsyncpa [#allocation9 + $0x1], 0  ;;  %s967_s15 = smov 0   ;;  %s969_s16 = smov 0  }
   0x9   :  { %s971_s17 = smov 0   ;;  %s973_s18 = smov 0  }
   0xa   :  { %s975_s19 = smov 0   ;;  %s977_s20 = smov 0  }
   0xb LB: > { %s998_s21 = sadd.s32 4294967295, %s927_s20   ;;  %s1228_s22 = sadd.s32 4294967294, %s927_s20   ;;  %s927_s20 = sphi %s977_s20, %s25_s20   ;;  %s923_s19 = sphi %s975_s19, %s1249_s19   ;;  %s919_s18 = sphi %s973_s18, %s1248_s18   ;;  %s915_s17 = sphi %s971_s17, %s1247_s17   ;;  %s911_s16 = sphi %s969_s16, %s1246_s16   ;;  %s907_s15 = sphi %s967_s15, %s1245_s15  }
   0xc   : > { %p59_p0 = scmp.ne.s32.totalorder %s911_s16, %s907_s15  ;;  %p1229_p1 = scmp.eq.s32.totalorder %s998_s21, 0 }
   0xd   : > { %p112_p3 = scmp.eq.s32.totalorder %s1228_s22, 1  ;;  %p588_p5 = scmp.ge.s32.totalorder %s927_s20, 1 }
   0xe   : > { %p1009_p4 = por %p1229_p1, %p59_p0  ;;  %p171_p7 = scmp.lt.s32.totalorder %s927_s20, 3 }
   0xf   : > { %p1014_p6 = por %p112_p3, %p59_p0  ;;  %s929_s26 = smov [#allocation5]  }
  0x10   : > { %p1019_p8 = pnand %p588_p5, %p171_p7  ;;  %s183_s27 = sshll.u32 %s929_s26, 4  ;;  %s184_s27 = int_to_ptr.vmem [resolvable:$true] %s183_s27 }
  0x11   : > { %s1232_s24 = scalar_select %p1014_p6, 1, 0 }
  0x12   : > { %p650_p9 = pneg %p1019_p8  ;;  %s37_s29 = sadd.s32 1, %s923_s19 }
  0x13   : > { %s744_s30 = scalar_lea.vmem %s184_s27, 512  ;;  %p752_p5 = scmp.lt.s32.totalorder %s184_s27, %s184_s27 }
  0x14   : > { %p1028_p11 = pnand %p650_p9, %p1229_p1  ;;  %p745_p13 = scmp.ne.s32.totalorder %s184_s27, %s744_s30 }
  0x15   : > { %p753_p7 = scmp.lt.s32.totalorder %s744_s30, %s744_s30 }
  0x16   : > { %p735_p12 = pneg %p1028_p11 }
  0x17   : > { %p754_p2 = por %p753_p7, %p752_p5 }
  0x18   : > { %p747_p0 = pnand %p745_p13, %p735_p12 }
  0x1a   : > { %p748_p3 = pneg %p747_p0 }
  0x1c   : > { %p755_p6 = pnand %p754_p2, %p748_p3 }
  0x1e   : > { %758 = shalt.err (!%p755_p6)
}
  0x1f   : > { %s930_s5 = smov 64   ;;  %s931_s6 = smov 4  }
  0x20   : > { %s1235_s1 = sld [smem:[#allocation15_spill]]  ;;  %p39_p2 = scmp.ge.s32.totalorder %s37_s29, 2 }
  0x21   : > { %s46_s9 = sadd.s32 1, %s915_s17  ;;  %p53_p6 = scmp.ne.s32.totalorder %s915_s17, %s911_s16 }
  0x22   : > { %p54_p9 = scmp.eq.s32.totalorder %s927_s20, 0  ;;  %s1251_s29 = smov (%p39_p2, %s37_s29), 0 }
  0x23   : > { %p1237_p13 = scmp.eq.s32.totalorder %s998_s21, 1  ;;  %s41_s12 = ssub.s32 %s923_s19, %s1251_s29 }
  0x24   : > { %p1046_p12 = por %p54_p9, %p53_p6  ;;  %p669_p3 = scmp.lt.s32.totalorder %s927_s20, 2 }
  0x25   : > { %p1052_p0 = por %p1237_p13, %p53_p6  ;;  %s197_s13 = sand.u32 1, %s915_s17  }
  0x26   : > { %653 = dma.hbm_to_vmem [thread:$0]  (!%p1028_p11), %s1235_s1, 512, %s184_s27, [#allocation6], %s930_s5, %s930_s5, %s931_s6  }
  0x27   : > { %p44_p11 = scmp.eq.s32.totalorder %s41_s12, 0  ;;  %s591_s14 = sshll.u32 %s197_s13, 4 }
  0x28   : > { %s612_s27 = sshll.u32 %s923_s19, 8  ;;  %s201_s6 = scalar_lea.vmem [#allocation2], %s591_s14 }
  0x29   : > { %s1061_s26 = scalar_select %p44_p11, %s915_s17, %s46_s9  }
  0x2a   : > { %s209_s5 = scalar_lea.hbm %s1223_s0, %s612_s27  ;;  %s210_s7 = sshll.u32 %s201_s6, 4  ;;  %s211_s7 = int_to_ptr.vmem [resolvable:$true] %s210_s7 }
  0x2b   : > { %p1069_p5 = pnand %p669_p3, %p1046_p12  ;;  %s198_s22 = scalar_lea.sflag [#allocation3], %s197_s13 }
  0x2c   : > { %s772_s12 = scalar_lea.vmem %s211_s7, 256  ;;  %s932_s9 = smov [#allocation2]  }
  0x2d   : > { %p761_p7 = pneg %p1069_p5  ;;  %p773_p2 = scmp.ne.s32.totalorder %s211_s7, %s772_s12 }
  0x2e   : > { %s777_s1 = sshll.u32 %s932_s9, 4  ;;  %s778_s1 = int_to_ptr.vmem [resolvable:$false] %s777_s1 }
  0x2f   : > { %p775_p6 = pnand %p773_p2, %p761_p7  ;;  %s779_s27 = scalar_lea.vmem %s778_s1, 512 }
  0x30   : > { %p780_p13 = scmp.lt.s32.totalorder %s211_s7, %s778_s1  ;;  %p781_p11 = scmp.lt.s32.totalorder %s779_s27, %s772_s12 }
  0x31   : > { %p776_p9 = pneg %p775_p6 }
  0x32   : > { %p782_p10 = por %p781_p11, %p780_p13 }
  0x34   : > { %p783_p1 = pnand %p782_p10, %p776_p9 }
  0x36   : > { %786 = shalt.err (!%p783_p1)
}
  0x37   : > { %s933_s10 = smov 128   ;;  %s934_s14 = smov 8  }
  0x38   : > { %657 = dma.hbm_to_vmem [thread:$0]  (!%p1069_p5), %s209_s5, 256, %s211_s7, %s198_s22, %s933_s10, %s933_s10, %s934_s14  }
  0x39   : > { %222 = sbr.rel (%p1019_p8) target bundleno = 342 (0x156), region = 28  ;;  %s1080_s13 = sand.u32 (!%p1019_p8), 1, %s911_s16  }
  0x3a   : > { %s595_s28 = sshll.u32 (!%p1019_p8), %s1080_s13, 4  ;;  %s225_s1 = scalar_lea.sflag (!%p1019_p8), [#allocation3], %s1080_s13 }
  0x3b   : > { %s228_s30 = scalar_lea.vmem (!%p1019_p8), [#allocation2], %s595_s28 }
  0x3e   : > { %890 = dma.done.wait (%p1009_p4), %s225_s1, 256  }
  0x3f   : > { %892 = vsyncadd (%p1009_p4), %s225_s1, 4294967040  ;;  %p1240_p1 = scmp.eq.s32.totalorder %s998_s21, 0 }
  0x41   : > { %894 = dma.done.wait (%p1240_p1), [#allocation6], 512   ;;  %p1241_p10 = pmov %p1240_p1 }
  0x42   : > { %v935_v0 = vmov 0.0   ;;  %vm936_vm0 = vmmov 0   ;;  %v729_v1 = vld [vmem:[#allocation5 + $0x18] sm:$0xff]   ;;  %v730_v2 = vld [vmem:[#allocation5 + $0x10] sm:$0xff]   ;;  %v731_v3 = vld [vmem:[#allocation5 + $0x8] sm:$0xff]   ;;  %vm303_vm1 = vcmask 523264  }
  0x43   : > { %896 = vsyncadd (%p1241_p10), [#allocation6], 4294966784  ;;  %626 = vmatprep.subr.bf16.mxu0 %v935_v0  ;;  %634 = vmatprep.mubr.msk.bf16.mxu0 %vm936_vm0, %v935_v0  ;;  %v732_v4 = vld [vmem:[#allocation5] sm:$0xff]   ;;  %v269_v6 = vld [vmem:[%s228_s30 + $0x8] sm:$0xff]  ;;  %s1093_s22 = scalar_lea.vmem [#allocation8], %s1080_s13  ;;  %s1097_s23 = scalar_lea.vmem [#allocation10], %s1080_s13 }
  0x44   : > { %627 = vmatpush3.bf16.msra.mxu0 %v729_v1  ;;  %v268_v5 = vld [vmem:[%s228_s30] sm:$0xff]  ;;  %362 = vst [vmem:[%s1093_s22] sm:$0x1] %v935_v0  ;;  %363 = vst [vmem:[%s1097_s23] sm:$0x1] %v935_v0  ;;  %s597_s25 = sshll.u32 %s1080_s13, 3  ;;  %s615_s7 = sshll.u32 %s919_s18, 7 }
  0x45   : > { %628 = vmatprep.subr.bf16.mxu0 %v935_v0  ;;  %v270_v7 = vpack.c.bf16 %v269_v6, %v268_v5  ;;  %s252_s5 = scalar_lea.vmem [#allocation7], %s597_s25  ;;  %s1107_s9 = scalar_lea.hbm %s1225_s2, %s615_s7 }
  0x46   : > { %s410_s6 = sshll.u32 %s252_s5, 4  ;;  %s387_s27 = scalar_lea.sflag [#allocation4], %s1080_s13  ;;  %s1102_s6 = int_to_ptr.vmem [resolvable:$true] %s410_s6 }
  0x47   : > { %s787_s10 = scalar_lea.vmem %s1102_s6, 128  ;;  %s937_s14 = smov [#allocation7]  }
  0x48   : > { %629 = vmatpush3.bf16.msra.mxu0 %v730_v2  ;;  %p788_p4 = scmp.ne.s32.totalorder %s1102_s6, %s787_s10  ;;  %s791_s28 = sshll.u32 %s937_s14, 4  ;;  %s792_s28 = int_to_ptr.vmem [resolvable:$false] %s791_s28 }
  0x49   : > { %630 = vmatprep.subr.bf16.mxu0 %v935_v0  ;;  %s793_s1 = scalar_lea.vmem %s792_s28, 256  ;;  %p794_p3 = scmp.lt.s32.totalorder %s1102_s6, %s792_s28 }
  0x4a   : > { %p789_p8 = pnand %p788_p4, %p1052_p0  ;;  %p795_p5 = scmp.lt.s32.totalorder %s793_s1, %s787_s10 }
  0x4c   : > { %631 = vmatpush3.bf16.msra.mxu0 %v731_v3  ;;  %p790_p12 = pneg %p789_p8  ;;  %p796_p7 = por %p795_p5, %p794_p3 }
  0x4d   : > { %632 = vmatprep.subr.bf16.mxu0 %v935_v0 }
  0x4e   : > { %p797_p2 = pnand %p796_p7, %p790_p12 }
  0x50   : > { %633 = vmatpush3.bf16.msra.mxu0 %v732_v4 }
  0x53   : > { %635 = vmatmul.mubr.msk.bf16.vlgmr.msra.gmra.mxu0 %vm303_vm1, %v270_v7 }
 0x113   : > { %v341_v8 = vpop.f32.mrf.mxu0 }
 0x114   : > { %v375_v11 = vmul.f32 %v341_v8, %v341_v8 }
 0x115   : > { %v636_v9 = vpop.f32.mrf.mxu0 }
 0x117   : > { %v344_v10 = vpop.f32.mrf.mxu0 }
 0x118   : > { %v619_v12 = vpack.c.bf16 %v344_v10, %v341_v8  ;;  %v365_v13 = vadd.f32 %v344_v10, %v341_v8  ;;  %v376_v14 = vmul.f32 %v344_v10, %v344_v10 }
 0x119   : > { %v637_v15 = vpop.f32.mrf.mxu0 }
 0x11a   : > { %620 = vst [vmem:[%s252_s5] sm:$0xff] %v619_v12   ;;  %v366_v16 = vrot.slane %v365_v13, 4  ;;  %v377_v17 = vadd.f32 %v376_v14, %v375_v11 }
 0x11b   : > { %800 = shalt.err (!%p797_p2)
}
 0x11c   : > { %s801_s30 = scalar_lea.hbm %s1107_s9, 128  ;;  %s805_s7 = scalar_lea.hbm %s1225_s2, 256 }
 0x11d   : > { %p802_p6 = scmp.ne.s32.totalorder %s1107_s9, %s801_s30  ;;  %p806_p11 = scmp.lt.s32.totalorder %s1107_s9, %s1225_s2 }
 0x11e   : > { %p807_p1 = scmp.lt.s32.totalorder %s805_s7, %s801_s30 }
 0x11f   : > { %p803_p9 = pnand %p802_p6, %p1052_p0 }
 0x120   : > { %p808_p10 = por %p807_p1, %p806_p11 }
 0x121   : > { %p804_p13 = pneg %p803_p9 }
 0x123   : > { %p809_p4 = pnand %p808_p10, %p804_p13 }
 0x125   : > { %812 = shalt.err (!%p809_p4)
}
 0x126   : > { %s938_s10 = smov 64   ;;  %s939_s14 = smov 4   ;;  %v367_v18 = vadd.f32 %v366_v16, %v365_v13  ;;  %v378_v19 = vrot.slane %v377_v17, 4  ;;  %v364_v26 = vld [vmem:[%s1093_s22] sm:$0x1] }
 0x127   : > { %644 = dma.vmem_to_hbm [thread:$0]  (%p1052_p0), %s1102_s6, 128, %s1107_s9, %s387_s27, %s938_s10, %s938_s10, %s939_s14  }
 0x128   : > { %v368_v20 = vrot.slane %v367_v18, 2  ;;  %v379_v21 = vadd.f32 %v378_v19, %v377_v17  ;;  %s391_s28 = sand.u32 1, %s998_s21   ;;  %s608_s1 = sshll.u32 %s919_s18, 4  ;;  %v374_v29 = vld [vmem:[%s1097_s23] sm:$0x1] }
 0x129   : > { %s426_s30 = sshll.u32 %s1093_s22, 4  ;;  %s439_s13 = sshll.u32 %s1097_s23, 4  ;;  %s1143_s30 = int_to_ptr.vmem [resolvable:$true] %s426_s30  ;;  %s1151_s13 = int_to_ptr.vmem [resolvable:$true] %s439_s13 }
 0x12a   : > { %v369_v22 = vadd.f32 %v368_v20, %v367_v18  ;;  %v380_v23 = vrot.slane %v379_v21, 2  ;;  %s1141_s27 = scalar_lea.hbm %s1226_s3, %s608_s1  ;;  %s1149_s25 = scalar_lea.hbm %s1227_s4, %s608_s1 }
 0x12b   : > { %s1153_s5 = scalar_lea.sflag [#allocation9], %s391_s28  ;;  %s813_s7 = scalar_lea.vmem %s1143_s30, 16 }
 0x12c   : > { %v370_v24 = vrot.slane %v369_v22, 1  ;;  %v381_v25 = vadd.f32 %v380_v23, %v379_v21  ;;  %p814_p8 = scmp.ne.s32.totalorder %s1143_s30, %s813_s7  ;;  %s940_s8 = smov [#allocation8]  }
 0x12d   : > { %s817_s12 = sshll.u32 %s940_s8, 4  ;;  %s818_s12 = int_to_ptr.vmem [resolvable:$false] %s817_s12 }
 0x12e   : > { %v371_v27 = vadd.f32 %v370_v24, %v369_v22  ;;  %v382_v28 = vrot.slane %v381_v25, 1  ;;  %p815_p12 = pnand %p814_p8, %p1052_p0  ;;  %s819_s10 = scalar_lea.vmem %s818_s12, 32 }
 0x12f   : > { %p820_p5 = scmp.lt.s32.totalorder %s1143_s30, %s818_s12  ;;  %p821_p7 = scmp.lt.s32.totalorder %s819_s10, %s813_s7 }
 0x130   : > { %v383_v30 = vadd.f32 %v382_v28, %v381_v25  ;;  %v372_v31 = vadd.f32 %v371_v27, %v364_v26  ;;  %p816_p3 = pneg %p815_p12 }
 0x131   : > { %p822_p2 = por %p821_p7, %p820_p5 }
 0x132   : > { %373 = vst [vmem:[%s1093_s22] sm:$0x1] %v372_v31  ;;  %v384_v32 = vadd.f32 %v383_v30, %v374_v29 }
 0x133   : > { %p823_p6 = pnand %p822_p2, %p816_p3 }
 0x135   : > { %826 = shalt.err (!%p823_p6)
}
 0x136   : > { %s827_s22 = scalar_lea.hbm %s1141_s27, 16  ;;  %s831_s1 = scalar_lea.hbm %s1226_s3, 32 }
 0x137   : > { %p828_p9 = scmp.ne.s32.totalorder %s1141_s27, %s827_s22  ;;  %p832_p1 = scmp.lt.s32.totalorder %s1141_s27, %s1226_s3 }
 0x138   : > { %p833_p10 = scmp.lt.s32.totalorder %s831_s1, %s827_s22 }
 0x139   : > { %p829_p13 = pnand %p828_p9, %p1052_p0 }
 0x13a   : > { %p834_p4 = por %p833_p10, %p832_p1 }
 0x13b   : > { %p830_p11 = pneg %p829_p13 }
 0x13d   : > { %p835_p8 = pnand %p834_p4, %p830_p11 }
 0x13f   : > { %838 = shalt.err (!%p835_p8)
}
 0x140   : > { %645 = dma.vmem_to_hbm [thread:$0]  (%p1052_p0), %s1143_s30, 16, %s1141_s27, %s1153_s5   ;;  %385 = vst [vmem:[%s1097_s23] sm:$0x1] %v384_v32 }
 0x141   : > { %s839_s18 = scalar_lea.vmem %s1151_s13, 16  ;;  %s941_s21 = smov [#allocation10]  }
 0x142   : > { %p840_p12 = scmp.ne.s32.totalorder %s1151_s13, %s839_s18  ;;  %s843_s7 = sshll.u32 %s941_s21, 4  ;;  %s844_s7 = int_to_ptr.vmem [resolvable:$false] %s843_s7 }
 0x143   : > { %s845_s8 = scalar_lea.vmem %s844_s7, 32  ;;  %p846_p7 = scmp.lt.s32.totalorder %s1151_s13, %s844_s7 }
 0x144   : > { %p841_p3 = pnand %p840_p12, %p1052_p0  ;;  %p847_p2 = scmp.lt.s32.totalorder %s845_s8, %s839_s18 }
 0x146   : > { %p842_p5 = pneg %p841_p3  ;;  %p848_p6 = por %p847_p2, %p846_p7 }
 0x148   : > { %p849_p9 = pnand %p848_p6, %p842_p5 }
 0x14a   : > { %852 = shalt.err (!%p849_p9)
}
 0x14b   : > { %s853_s30 = scalar_lea.hbm %s1149_s25, 16  ;;  %s857_s12 = scalar_lea.hbm %s1227_s4, 32 }
 0x14c   : > { %p854_p13 = scmp.ne.s32.totalorder %s1149_s25, %s853_s30  ;;  %p858_p10 = scmp.lt.s32.totalorder %s1149_s25, %s1227_s4 }
 0x14d   : > { %p859_p4 = scmp.lt.s32.totalorder %s857_s12, %s853_s30 }
 0x14e   : > { %p855_p11 = pnand %p854_p13, %p1052_p0 }
 0x14f   : > { %p860_p8 = por %p859_p4, %p858_p10 }
 0x150   : > { %p856_p1 = pneg %p855_p11 }
 0x152   : > { %p861_p12 = pnand %p860_p8, %p856_p1 }
 0x154   : > { %864 = shalt.err (!%p861_p12)
}
 0x155   : > { %646 = dma.vmem_to_hbm [thread:$0]  (%p1052_p0), %s1151_s13, 16, %s1149_s25, %s1153_s5  }
 0x156 PF: > { %s451_s14 = sand.u32 1, %s907_s15   ;;  %p1242_p3 = scmp.ne.s32.totalorder %s1232_s24, 0 }
 0x157   : > { %p1243_p5 = scmp.ge.s32.totalorder %s927_s20, 2  ;;  %s452_s28 = scalar_lea.sflag [#allocation4], %s451_s14 }
 0x159   : > { %p659_p7 = pnand %p1243_p5, %p1242_p3 }
 0x15b   : > { %p660_p2 = pneg %p659_p7 }
 0x15d   : > { %898 = dma.done.wait (%p660_p2), %s452_s28, 128  }
 0x15e   : > { %900 = vsyncadd (%p660_p2), %s452_s28, 4294967168  ;;  %s1244_s1 = sadd.s32 4294967294, %s927_s20  }
 0x15f   : > { %s460_s6 = sand.u32 1, %s1244_s1  }
 0x160   : > { %s461_s11 = scalar_lea.sflag [#allocation9], %s460_s6 }
 0x161   : > { %902 = dma.done.wait (%p660_p2), %s461_s11, 32  }
 0x162   : > { %904 = vsyncadd (%p660_p2), %s461_s11, 4294967264  ;;  %s25_s20 = sadd.s32 1, %s927_s20   ;;  %s1245_s15 = smov %s911_s16 }
 0x163   : > { %p22_p0 = scmp.ge.s32.totalorder %s25_s20, 4   ;;  %s1246_s16 = smov %s915_s17 }
 0x164   : > { %s1247_s17 = smov %s1061_s26  ;;  %s1248_s18 = smov %s923_s19 }
 0x165   : > { %s1249_s19 = smov %s1251_s29  ;;  %24 = sbr.rel (!%p22_p0) target bundleno = 11 (0xb), region = 113 }
 0x16a   :  { %473 = vsyncpa [#allocation3], 1 }
 0x16b   :  { %475 = vsyncpa [#allocation3 + $0x1], 1 }
 0x16c   :  { %476 = vsyncpa [#allocation6], 1 }
 0x16d   :  { %477 = vsyncpa [#allocation4], 1 }
 0x16e   :  { %479 = vsyncpa [#allocation4 + $0x1], 1 }
 0x16f   :  { %480 = vsyncpa [#allocation9], 1 }
 0x170   :  { %482 = vsyncpa [#allocation9 + $0x1], 1 }

</bundles_post_ra>
